<compile_context>
chip_gen: v7x
topology: tpu7x:2x2x1
jax: 0.10.0
libtpu: 0.0.40
codegen_flags: <defaults>
</compile_context>

<pallas_src>
import functools

import jax
import jax.numpy as jnp
from jax import lax
from jax.experimental import pallas as pl
from jax.experimental.pallas import tpu as pltpu


def _round_up(x, m):
    return ((x + m - 1) // m) * m


def _padded_bytes(shape, itemsize):
    """Approximate VMEM footprint of a buffer ((8,128)-padded minor dims)."""
    s = list(shape)
    s[-1] = _round_up(s[-1], 128)
    if len(s) >= 2:
        s[-2] = _round_up(s[-2], 8)
    n = 1
    for d in s:
        n *= max(int(d), 1)
    return n * itemsize


def _tpu_vmem_info():
    """(vmem_capacity_bytes, multi_tensorcore) with a safe fallback."""
    vmem_cap = None
    try:
        info = pltpu.get_tpu_info()
        vmem_cap = int(getattr(info, "vmem_capacity_bytes", 0)) or None
    except Exception:
        vmem_cap = None
    if vmem_cap is None:
        vmem_cap = 128 * 1024 * 1024
    # v7x exposes 64 MiB VMEM per TensorCore and packs 2 TCs per chip;
    # v5e / v6e have 128 MiB and a single TC.
    multi_tc = vmem_cap < 128 * 1024 * 1024
    return vmem_cap, multi_tc


def _choose_tiles(B, T, D, in_itemsize, vmem_cap, multi_tc):
    """Pick (batch tile, time tile), VMEM- and generation-aware."""
    slab_budget = vmem_cap // 4            # budget for the double-buffered input slab
    d_pad = _round_up(D, 128)              # lane-padded feature dim

    def slab_bytes(tb_, tt_):
        return 2 * tb_ * _round_up(tt_, 8) * d_pad * in_itemsize

    # Batch tile: multiple of 8 for sublane-dense output stores (full B if B <= 8).
    if B <= 8:
        tb = B
    else:
        tb = 8

        def split_ok(tb_cand):
            if not multi_tc:
                return True                # single TensorCore: no balance constraint
            nt = pl.cdiv(B, tb_cand)
            return nt % 2 == 0 or nt >= 8  # keep both v7x TensorCores evenly loaded

        ref_tt = min(T, 512)
        while (tb * 2 <= 128 and tb * 2 <= B
               and slab_bytes(tb * 2, ref_tt) <= slab_budget
               and split_ok(tb * 2)):
            tb *= 2

    # Time tile: full T if it fits; otherwise prefer a multiple of 128 that
    # divides T (lane-dense logits / exp / reduces, no ragged last tile).
    max_tt = slab_budget // max(2 * tb * d_pad * in_itemsize, 1)
    if max_tt >= T:
        tt = T
    else:
        tt = 0
        for k in range(min(int(max_tt) // 128, 4096), 0, -1):
            if T % (128 * k) == 0:
                tt = 128 * k
                break
        if tt == 0:
            tt = (int(max_tt) // 128) * 128       # lane-dense, ragged last tile
        if tt == 0:
            tt = max(8, (int(max_tt) // 8) * 8)   # tiny-budget fallback
    return int(tb), int(tt)


def _vmem_limit_bytes(tb, tt, D, in_itemsize, out_itemsize, vmem_cap):
    """Scoped-VMEM limit derived from the actual allocations (plus headroom)."""
    need = (2 * _padded_bytes((tb, tt, D), in_itemsize)   # double-buffered input slab
            + 2 * _padded_bytes((tb, D), out_itemsize)    # double-buffered output block
            + 2 * _padded_bytes((1, D), 4)                # weight row
            + 2 * _padded_bytes((tb, 1), 4)               # m / l scratch
            + _padded_bytes((tb, D), 4))                  # acc scratch
    limit = int(need * 1.25) + (2 << 20)                  # compiler-scratch headroom
    return int(min(max(limit, 4 << 20), (vmem_cap * 3) // 4))


def _location_attention_kernel(x_ref, w_ref, o_ref, m_sc, l_sc, acc_sc,
                               *, seq_len, t_tile):
    # x_ref : (TB, TT, D) input slab (native dtype)
    # w_ref : (1, D) lane-dense Linear weight row
    # o_ref : (TB, D) output block (written once, on the last time tile)
    # m_sc  : (TB, 1) f32 running max        (persists across time tiles)
    # l_sc  : (TB, 1) f32 running denominator
    # acc_sc: (TB, D) f32 running weighted sum of x
    t = pl.program_id(1)
    last = pl.num_programs(1) - 1

    @pl.when(t == 0)
    def _():
        m_sc[...] = jnp.full_like(m_sc, -jnp.inf)
        l_sc[...] = jnp.zeros_like(l_sc)
        acc_sc[...] = jnp.zeros_like(acc_sc)

    w = w_ref[...].astype(x_ref.dtype).reshape(1, 1, -1)     # (1, 1, D)

    def step(mask_tail):
        x = x_ref[...]                                       # (TB, TT, D) native dtype
        if mask_tail:
            tb_, tt_ = x.shape[0], x.shape[1]
            col = lax.broadcasted_iota(jnp.int32, (tb_, tt_), 1) + t * t_tile
            valid = col < seq_len
            x = jnp.where(valid[..., None], x, jnp.zeros_like(x))

        # Linear(D -> 1): VPU broadcast-mul in native dtype, f32 lane reduce.
        # Bias omitted: softmax over time is shift-invariant to a scalar bias.
        logits = jnp.sum(x * w, axis=-1, dtype=jnp.float32)  # (TB, TT) f32
        if mask_tail:
            # Large finite negative (not -inf) so a fully-masked tile can never
            # poison the running max / alpha with NaNs.
            logits = jnp.where(valid, logits, jnp.float32(-1e30))

        # Online softmax over the time axis (f32 state).
        m_prev = m_sc[...]                                   # (TB, 1)
        m_new = jnp.maximum(m_prev, jnp.max(logits, axis=-1, keepdims=True))
        alpha = jnp.exp(m_prev - m_new)                      # (TB, 1)
        p = jnp.exp(logits - m_new)                          # (TB, TT) f32

        l_sc[...] = alpha * l_sc[...] + jnp.sum(p, axis=-1, keepdims=True)
        # Weighted sum over time as a batched M=1 contraction (MXU otherwise
        # idle), avoiding the materialized (TB, TT, D) f32 temporary and the
        # lane->sublane relayout of p.
        pv = jnp.einsum("bqt,btd->bqd", p.astype(x.dtype)[:, None, :], x,
                        preferred_element_type=jnp.float32)  # (TB, 1, D) f32
        acc_sc[...] = alpha * acc_sc[...] + pv[:, 0, :]
        m_sc[...] = m_new

    ragged = (seq_len % t_tile) != 0
    if ragged:
        # Masking work is only compiled into (and executed on) the last tile.
        @pl.when(t != last)
        def _():
            step(False)

        @pl.when(t == last)
        def _():
            step(True)
    else:
        step(False)

    @pl.when(t == last)
    def _():
        inv_l = pl.reciprocal(l_sc[...], approx=False)       # exact 1 / denom
        o_ref[...] = (acc_sc[...] * inv_l).astype(o_ref.dtype)


def location_attention(inputs, weight, bias=None, *, tb=None, tt=None):
    """inputs: (B, T, D); weight: (1, D) (torch nn.Linear layout; (D,1)/(D,)
    also accepted); bias accepted for API parity but ignored inside the kernel
    (softmax shift-invariance makes it a mathematical no-op). Returns (B, D)."""
    del bias  # no-op for this forward pass
    B, T, D = inputs.shape
    weight = jnp.asarray(weight).reshape(1, D)

    # TODO(synk): if the production feature dim stays at n_input=32 (< 128), the
    # (8,128) lane layout pads D ~4x in VMEM/vregs; a (B, T*D)-packed layout
    # with an in-kernel segmented reduction would recover that utilization.

    in_itemsize = jnp.dtype(inputs.dtype).itemsize
    out_itemsize = in_itemsize
    vmem_cap, multi_tc = _tpu_vmem_info()
    auto_tb, auto_tt = _choose_tiles(B, T, D, in_itemsize, vmem_cap, multi_tc)
    tb = auto_tb if tb is None else tb
    tt = auto_tt if tt is None else tt

    kernel = functools.partial(_location_attention_kernel, seq_len=T, t_tile=tt)
    grid = (pl.cdiv(B, tb), pl.cdiv(T, tt))

    return pl.pallas_call(
        kernel,
        out_shape=jax.ShapeDtypeStruct((B, D), inputs.dtype),
        grid_spec=pltpu.PrefetchScalarGridSpec(
            num_scalar_prefetch=0,
            grid=grid,
            in_specs=[
                pl.BlockSpec((tb, tt, D), lambda i, t: (i, t, 0)),  # input slab
                pl.BlockSpec((1, D), lambda i, t: (0, 0)),          # shared weight row
            ],
            out_specs=pl.BlockSpec((tb, D), lambda i, t: (i, 0)),   # resident across t
            scratch_shapes=[
                pltpu.VMEM((tb, 1), jnp.float32),   # running max
                pltpu.VMEM((tb, 1), jnp.float32),   # running denominator
                pltpu.VMEM((tb, D), jnp.float32),   # running weighted sum
            ],
        ),
        compiler_params=pltpu.CompilerParams(
            dimension_semantics=("parallel", "arbitrary"),
            vmem_limit_bytes=_vmem_limit_bytes(tb, tt, D, in_itemsize,
                                               out_itemsize, vmem_cap),
        ),
    )(inputs, weight)


def location_attention_ref(inputs, weight, bias):
    # Pure-JAX reference mirroring the PyTorch forward exactly (bias included).
    logits = jnp.einsum("btd,od->bto", inputs, weight) + bias.reshape(1, 1, 1)
    attn = jax.nn.softmax(logits, axis=1)                    # softmax over time
    return jnp.einsum("btd,bto->bd", inputs, attn)           # bmm(x^T, attn).squeeze(-1)


if __name__ == "__main__":
    key = jax.random.PRNGKey(0)
    k_x, k_w, k_b, k_x2 = jax.random.split(key, 4)

    # Case 1: small shapes consistent with the module (batch=2, seq=8, n_input=32).
    B, T, D = 2, 8, 32
    x = jax.random.normal(k_x, (B, T, D), dtype=jnp.float32)
    weight = (jax.random.normal(k_w, (1, D), dtype=jnp.float32)
              / jnp.sqrt(jnp.float32(D)))                    # torch layout (1, n_input)
    bias = jax.random.normal(k_b, (1,), dtype=jnp.float32) * 0.1

    out = jax.block_until_ready(location_attention(x, weight, bias))
    ref = location_attention_ref(x, weight, bias)
    assert out.shape == (B, D), out.shape
    assert jnp.allclose(out, ref, atol=1e-5, rtol=1e-5), (
        float(jnp.max(jnp.abs(out - ref))))

    # Case 2: exercise batch-edge padding (B % 8 != 0), the time-tiled
    # online-softmax path, and a ragged last time tile (T % tt != 0) that is
    # now masked only on the final grid step.
    B2, T2 = 10, 20
    x2 = jax.random.normal(k_x2, (B2, T2, D), dtype=jnp.float32)
    out2 = jax.block_until_ready(location_attention(x2, weight, bias, tb=8, tt=8))
    ref2 = location_attention_ref(x2, weight, bias)
    assert out2.shape == (B2, D), out2.shape
    assert jnp.allclose(out2, ref2, atol=1e-5, rtol=1e-5), (
        float(jnp.max(jnp.abs(out2 - ref2))))

    print("KERNEL_OK")
</pallas_src>

<mosaic_0001>
module attributes {stable_mosaic.version = 11 : i64} {
  func.func @_location_attention_kernel(%arg0: i32, %arg1: i32, %arg2: memref<2x8x32xf32, #tpu.memory_space<vmem>>, %arg3: memref<1x32xf32, #tpu.memory_space<vmem>>, %arg4: memref<2x32xf32, #tpu.memory_space<vmem>>, %arg5: memref<2x1xf32, #tpu.memory_space<vmem>>, %arg6: memref<2x1xf32, #tpu.memory_space<vmem>>, %arg7: memref<2x32xf32, #tpu.memory_space<vmem>>) attributes {dimension_semantics = [#tpu.dimension_semantics<parallel>, #tpu.dimension_semantics<arbitrary>], iteration_bounds = array<i64: 1, 1>, scalar_prefetch = 0 : i64, scratch_operands = 3 : i64, tpu.core_type = #tpu.core_type<tc>, window_params = [{transform_indices = @transform_0, window_bounds = array<i64: 2, 8, 32>}, {pipeline_mode = #tpu.pipeline_mode<synchronous>, transform_indices = @transform_1, window_bounds = array<i64: 1, 32>}, {transform_indices = @transform_2, window_bounds = array<i64: 2, 32>}]} {
    %c0_i32 = arith.constant 0 : i32
    %0 = arith.cmpi eq, %arg1, %c0_i32 : i32
    %1 = arith.extui %0 : i1 to i32
    %c0_i32_0 = arith.constant 0 : i32
    %2 = arith.cmpi ne, %1, %c0_i32_0 : i32
    scf.if %2 {
      %cst_22 = arith.constant 0xFF800000 : f32
      %36 = vector.broadcast %cst_22 : f32 to vector<2x1xf32>
      %c0_23 = arith.constant 0 : index
      %c0_24 = arith.constant 0 : index
      %37 = vector.load %arg5[%c0_23, %c0_24] : memref<2x1xf32, #tpu.memory_space<vmem>>, vector<2x1xf32>
      tpu.vector_store %arg5[%c0_23, %c0_24], %36 {strides = array<i32>} : memref<2x1xf32, #tpu.memory_space<vmem>>, vector<2x1xf32>,
      %cst_25 = arith.constant 0.000000e+00 : f32
      %38 = vector.broadcast %cst_25 : f32 to vector<2x1xf32>
      %c0_26 = arith.constant 0 : index
      %c0_27 = arith.constant 0 : index
      %39 = vector.load %arg6[%c0_26, %c0_27] : memref<2x1xf32, #tpu.memory_space<vmem>>, vector<2x1xf32>
      tpu.vector_store %arg6[%c0_26, %c0_27], %38 {strides = array<i32>} : memref<2x1xf32, #tpu.memory_space<vmem>>, vector<2x1xf32>,
      %cst_28 = arith.constant 0.000000e+00 : f32
      %40 = vector.broadcast %cst_28 : f32 to vector<2x32xf32>
      %c0_29 = arith.constant 0 : index
      %c0_30 = arith.constant 0 : index
      %41 = vector.load %arg7[%c0_29, %c0_30] : memref<2x32xf32, #tpu.memory_space<vmem>>, vector<2x32xf32>
      tpu.vector_store %arg7[%c0_29, %c0_30], %40 {strides = array<i32>} : memref<2x32xf32, #tpu.memory_space<vmem>>, vector<2x32xf32>,
    } else {
    }
    %c0 = arith.constant 0 : index
    %c0_1 = arith.constant 0 : index
    %3 = vector.load %arg3[%c0, %c0_1] : memref<1x32xf32, #tpu.memory_space<vmem>>, vector<1x32xf32>
    %4 = vector.shape_cast %3 : vector<1x32xf32> to vector<1x1x32xf32>
    %c0_2 = arith.constant 0 : index
    %c0_3 = arith.constant 0 : index
    %c0_4 = arith.constant 0 : index
    %5 = vector.load %arg2[%c0_2, %c0_3, %c0_4] : memref<2x8x32xf32, #tpu.memory_space<vmem>>, vector<2x8x32xf32>
    %6 = vector.broadcast %4 : vector<1x1x32xf32> to vector<2x8x32xf32>
    %7 = arith.mulf %5, %6 : vector<2x8x32xf32>
    %cst = arith.constant dense<0.000000e+00> : vector<2x8xf32>
    %8 = vector.multi_reduction <add>, %7, %cst [2] : vector<2x8x32xf32> to vector<2x8xf32>
    %c0_5 = arith.constant 0 : index
    %c0_6 = arith.constant 0 : index
    %9 = vector.load %arg5[%c0_5, %c0_6] : memref<2x1xf32, #tpu.memory_space<vmem>>, vector<2x1xf32>
    %cst_7 = arith.constant dense<0xFF800000> : vector<2xf32>
    %10 = vector.multi_reduction <maximumf>, %8, %cst_7 [1] : vector<2x8xf32> to vector<2xf32>
    %11 = vector.shape_cast %10 : vector<2xf32> to vector<2x1xf32>
    %12 = arith.maximumf %9, %11 : vector<2x1xf32>
    %13 = arith.subf %9, %12 : vector<2x1xf32>
    %14 = math.exp %13 : vector<2x1xf32>
    %15 = vector.broadcast %12 : vector<2x1xf32> to vector<2x8xf32>
    %16 = arith.subf %8, %15 : vector<2x8xf32>
    %17 = math.exp %16 : vector<2x8xf32>
    %c0_8 = arith.constant 0 : index
    %c0_9 = arith.constant 0 : index
    %18 = vector.load %arg6[%c0_8, %c0_9] : memref<2x1xf32, #tpu.memory_space<vmem>>, vector<2x1xf32>
    %19 = arith.mulf %14, %18 : vector<2x1xf32>
    %cst_10 = arith.constant dense<0.000000e+00> : vector<2xf32>
    %20 = vector.multi_reduction <add>, %17, %cst_10 [1] : vector<2x8xf32> to vector<2xf32>
    %21 = vector.shape_cast %20 : vector<2xf32> to vector<2x1xf32>
    %22 = arith.addf %19, %21 : vector<2x1xf32>
    %c0_11 = arith.constant 0 : index
    %c0_12 = arith.constant 0 : index
    %23 = vector.load %arg6[%c0_11, %c0_12] : memref<2x1xf32, #tpu.memory_space<vmem>>, vector<2x1xf32>
    tpu.vector_store %arg6[%c0_11, %c0_12], %22 {strides = array<i32>} : memref<2x1xf32, #tpu.memory_space<vmem>>, vector<2x1xf32>,
    %24 = vector.shape_cast %17 : vector<2x8xf32> to vector<2x1x8xf32>
    "tpu.trace_start"() <{level = 10 : i32, message = "bqt,btd->bqd"}> : () -> ()
    %cst_13 = arith.constant dense<0.000000e+00> : vector<2x1x32xf32>
    %25 = tpu.matmul %24, %5, %cst_13 {dimension_numbers = #tpu.dot_dimension_numbers<[2], [1], [1], [2], [0, 0, 0, 1, 1, 2], [0], [0]>} : vector<2x1x8xf32>, vector<2x8x32xf32>, vector<2x1x32xf32> -> vector<2x1x32xf32>
    "tpu.trace_stop"() : () -> ()
    %c0_14 = arith.constant 0 : index
    %c0_15 = arith.constant 0 : index
    %26 = vector.load %arg7[%c0_14, %c0_15] : memref<2x32xf32, #tpu.memory_space<vmem>>, vector<2x32xf32>
    %27 = vector.broadcast %14 : vector<2x1xf32> to vector<2x32xf32>
    %28 = arith.mulf %27, %26 : vector<2x32xf32>
    %29 = vector.shape_cast %25 : vector<2x1x32xf32> to vector<2x32xf32>
    %30 = arith.addf %28, %29 : vector<2x32xf32>
    %c0_16 = arith.constant 0 : index
    %c0_17 = arith.constant 0 : index
    %31 = vector.load %arg7[%c0_16, %c0_17] : memref<2x32xf32, #tpu.memory_space<vmem>>, vector<2x32xf32>
    tpu.vector_store %arg7[%c0_16, %c0_17], %30 {strides = array<i32>} : memref<2x32xf32, #tpu.memory_space<vmem>>, vector<2x32xf32>,
    %c0_18 = arith.constant 0 : index
    %c0_19 = arith.constant 0 : index
    %32 = vector.load %arg5[%c0_18, %c0_19] : memref<2x1xf32, #tpu.memory_space<vmem>>, vector<2x1xf32>
    tpu.vector_store %arg5[%c0_18, %c0_19], %12 {strides = array<i32>} : memref<2x1xf32, #tpu.memory_space<vmem>>, vector<2x1xf32>,
    %c0_i32_20 = arith.constant 0 : i32
    %33 = arith.cmpi eq, %arg1, %c0_i32_20 : i32
    %34 = arith.extui %33 : i1 to i32
    %c0_i32_21 = arith.constant 0 : i32
    %35 = arith.cmpi ne, %34, %c0_i32_21 : i32
    scf.if %35 {
      %c0_22 = arith.constant 0 : index
      %c0_23 = arith.constant 0 : index
      %36 = vector.load %arg6[%c0_22, %c0_23] : memref<2x1xf32, #tpu.memory_space<vmem>>, vector<2x1xf32>
      %37 = tpu.reciprocal %36 : vector<2x1xf32> -> vector<2x1xf32>
      %c0_24 = arith.constant 0 : index
      %c0_25 = arith.constant 0 : index
      %38 = vector.load %arg7[%c0_24, %c0_25] : memref<2x32xf32, #tpu.memory_space<vmem>>, vector<2x32xf32>
      %39 = vector.broadcast %37 : vector<2x1xf32> to vector<2x32xf32>
      %40 = arith.mulf %38, %39 : vector<2x32xf32>
      %c0_26 = arith.constant 0 : index
      %c0_27 = arith.constant 0 : index
      %41 = vector.load %arg4[%c0_26, %c0_27] : memref<2x32xf32, #tpu.memory_space<vmem>>, vector<2x32xf32>
      tpu.vector_store %arg4[%c0_26, %c0_27], %40 {strides = array<i32>} : memref<2x32xf32, #tpu.memory_space<vmem>>, vector<2x32xf32>,
    } else {
    }
    return
  }
  func.func @transform_0(%arg0: i32, %arg1: i32) -> (i32, i32, i32) {
    %c0_i32 = arith.constant 0 : i32
    %c0_i32_0 = arith.constant 0 : i32
    return %arg0, %arg1, %c0_i32 : i32, i32, i32
  }
  func.func @transform_1(%arg0: i32, %arg1: i32) -> (i32, i32) {
    %c0_i32 = arith.constant 0 : i32
    %c0_i32_0 = arith.constant 0 : i32
    %c0_i32_1 = arith.constant 0 : i32
    return %c0_i32, %c0_i32_0 : i32, i32
  }
  func.func @transform_2(%arg0: i32, %arg1: i32) -> (i32, i32) {
    %c0_i32 = arith.constant 0 : i32
    %c0_i32_0 = arith.constant 0 : i32
    return %arg0, %c0_i32 : i32, i32
  }
}

</mosaic_0001>

<bundles_post_ra>
// kernel: tpu_custom_call.1
= control target key start
LH: loop header
LB: loop body
LE: loop exit
PB: predicated region body
PF: predicated region fallthrough
CT: control target
= control target key end

     0   :  { %7 = vsyncpa [#allocation6], 0  ;;  %s457_s0 = inlined_call_operand.hbm [shape: f32[2,8,32], index: 0, kind: input, shape index: {}]   ;;  %s458_s1 = inlined_call_operand.vmem [shape: f32[1,32], index: 1, kind: input, shape index: {}]   ;;  %s459_s2 = inlined_call_operand.hbm [shape: f32[2,32], index: 2, kind: output, shape index: {}]  }
   0x1   :  { %8 = vsyncpa [#allocation7], 0  ;;  %s395_s9 = smov [#allocation5]   ;;  %s347_s13 = scalar_lea.hbm %s457_s0, 256 }
   0x2   :  { %s14_s10 = sshll.u32 %s395_s9, 4  ;;  %p348_p0 = scmp.ne.s32.totalorder %s457_s0, %s347_s13  ;;  %s15_s10 = int_to_ptr.vmem [resolvable:$true] %s14_s10 }
   0x3   :  { %p351_p1 = scmp.lt.u32.totalorder %s347_s13, %s457_s0 }
   0x5   :  { %p353_p2 = pnand %p351_p1, %p348_p0 }
   0x7   :  { %356 = shalt.err (!%p353_p2)
}
   0x8   :  { %s357_s18 = scalar_lea.vmem %s15_s10, 256  ;;  %p362_p4 = scmp.lt.s32.totalorder %s15_s10, %s15_s10 }
   0x9   :  { %p358_p3 = scmp.ne.s32.totalorder %s15_s10, %s357_s18  ;;  %p363_p5 = scmp.lt.s32.totalorder %s357_s18, %s357_s18 }
   0xb   :  { %p364_p6 = por %p363_p5, %p362_p4 }
   0xd   :  { %p365_p7 = pnand %p364_p6, %p358_p3 }
   0xf   :  { %368 = shalt.err (!%p365_p7)
}
  0x10   :  { %s396_s19 = smov 128   ;;  %s397_s20 = smov 8  }
  0x11   :  { %20 = dma.hbm_to_vmem [thread:$0]  %s457_s0, 256, %s15_s10, [#allocation6], %s396_s19, %s396_s19, %s397_s20  }
  0x12   :  { %391 = dma.done.wait [#allocation6], 256  }
  0x13   :  { %392 = vsyncadd [#allocation6], 4294967040  ;;  %v312_v0 = vld [vmem:[%s458_s1] ss:$0 sm:$0xff]  ;;  %v36_v1 = vld [vmem:[#allocation5] sm:$0xff]  ;;  %vm46_vm0 = vcmask 261120   ;;  %v56_v8 = vlaneseq }
  0x14   :  { %v37_v2 = vld [vmem:[#allocation5 + $0x8] sm:$0xff]  ;;  %v44_v3 = vmul.f32 %v312_v0, %v36_v1  ;;  %vm30_vm1 = vcmask 1024   ;;  %v398_v7 = vmov -inf   ;;  %vm66_vm2 = vcmask 1041409   ;;  %s402_s0 = smov [#allocation8]  }
  0x15   :  { %v45_v4 = vmul.f32 %v312_v0, %v37_v2  ;;  %31 = vst.msk [vmem:[#allocation2] sm:$0x3] %vm30_vm1, %v398_v7  ;;  %v57_v9 = vand.u32 127, %v56_v8  ;;  %v59_v10 = vshrl.u32 %v56_v8, 7  ;;  %vm69_vm3 = vcmask 58368   ;;  %s303_s1 = sshll.u32 %s402_s0, 4  ;;  %s304_s1 = int_to_ptr.vmem [resolvable:$true] %s303_s1 }
  0x16   :  { %v47_v5 = vsel %vm46_vm0, %v44_v3, 0.0  ;;  %v399_v18 = vmov 0   ;;  %v400_v19 = vmov 0.0   ;;  %vm33_vm4 = vcmask 254976   ;;  %s369_s25 = scalar_lea.vmem %s304_s1, 32  ;;  %p374_p9 = scmp.lt.s32.totalorder %s304_s1, %s304_s1 }
  0x17   :  { %48 = vadd.xlane.f32.xlu0 %v47_v5  ;;  %v50_v6 = vsel %vm46_vm0, %v45_v4, 0.0  ;;  %v60_v12 = vsub.s32 %v57_v9, %v59_v10  ;;  %337 = vset.pattern.permute.xlu1 %v399_v18  ;;  %32 = vst.msk [vmem:[#allocation3] sm:$0x3] %vm30_vm1, %v400_v19  ;;  %v83_v24 = vsub.s32 0, %v59_v10  ;;  %v87_v25 = vsub.s32 1, %v59_v10  ;;  %p370_p8 = scmp.ne.s32.totalorder %s304_s1, %s369_s25  ;;  %p375_p10 = scmp.lt.s32.totalorder %s369_s25, %s369_s25 }
  0x18   :  { %338 = vset.pattern.permute.xlu0 %v399_v18  ;;  %319 = vmatprep.subr.mxu0 %v400_v19  ;;  %34 = vst.msk [vmem:[#allocation4] sm:$0x3] %vm33_vm4, %v400_v19  ;;  %vm401_vm5 = vmmov 0   ;;  %vm123_vm6 = vcmask 64512  }
  0x19   :  { %324 = vmatprep.subr.mxu1 %v400_v19  ;;  %320 = vmatpush3.msra.mxu0 %v36_v1  ;;  %p376_p11 = por %p375_p10, %p374_p9 }
  0x1a   :  { %325 = vmatpush3.msra.mxu1 %v37_v2  ;;  %321 = vmatprep.mubr.msk.f32.mxu0 %vm401_vm5, %v400_v19 }
  0x1b   :  { %51 = vadd.xlane.f32.xlu0 %v50_v6  ;;  %326 = vmatprep.mubr.msk.f32.mxu1 %vm401_vm5, %v400_v19  ;;  %p377_p12 = pnand %p376_p11, %p370_p8 }
  0x1c   :  { %v53_v20 = vld [vmem:[#allocation2] sm:$0x3] }
  0x1e   :  { %v97_v43 = vld [vmem:[#allocation3] sm:$0x3] }
  0x1f   :  { %v268_v49 = vld [vmem:[#allocation4] sm:$0x3] }
  0xa4   :  { %v49_v11 = vpop.xlane.xlu0 %48 }
  0xa5   :  { %v61_v14 = vrot.slane %v49_v11, %v60_v12 }
  0xa8   :  { %v52_v13 = vpop.xlane.xlu0 %51 }
  0xa9   :  { %v65_v15 = vrot.slane %v52_v13, %v60_v12 }
  0xab   :  { %v67_v16 = vsel %vm66_vm2, %v65_v15, %v61_v14 }
  0xac   :  { %v70_v17 = vsel %vm69_vm3, %v67_v16, -inf }
  0xad   :  { %71 = vmax.xlane.f32.xlu1 %v70_v17 }
 0x13a   :  { %v72_v21 = vpop.xlane.xlu1 %71 }
 0x13b   :  { %v73_v22 = vmax.f32 %v53_v20, %v72_v21 }
 0x13d   :  { %v74_v23 = vsub.f32 %v53_v20, %v73_v22  ;;  %283 = vst.msk [vmem:[#allocation2] sm:$0x3] %vm30_vm1, %v73_v22  ;;  %79 = vperm.xlu1 %337, %v73_v22  }
 0x13f   :  { %v75_v33 = vmul.f32 1.442695, %v74_v23 }
 0x1bc   :  { %v80_v26 = vpop.permute.xlu1 %79 }
 0x1bd   :  { %v84_v27 = vrot.slane %v80_v26, %v83_v24  ;;  %v88_v28 = vrot.slane %v80_v26, %v87_v25 }
 0x1bf   :  { %v91_v29 = vsub.f32 %v49_v11, %v84_v27  ;;  %v92_v30 = vsub.f32 %v52_v13, %v88_v28 }
 0x1c1   :  { %v93_v31 = vmul.f32 1.442695, %v91_v29  ;;  %v95_v32 = vmul.f32 1.442695, %v92_v30 }
 0x1c3   :  { %339 = vpow2.f32 %v93_v31 }
 0x1c4   :  { %341 = vpow2.f32 %v95_v32 }
 0x1c5   :  { %343 = vpow2.f32 %v75_v33 }
 0x1cd   :  { %v340_v34 = vpop.eup %339 }
 0x1ce   :  { %v342_v35 = vpop.eup %341  ;;  %102 = vperm.xlu1 %337, %v340_v34  }
 0x1cf   :  { %105 = vperm.xlu0 %338, %v342_v35   ;;  %v344_v36 = vpop.eup %343 }
 0x1d0   :  { %v98_v44 = vmul.f32 %v344_v36, %v97_v43 }
 0x1d3   :  { %271 = vperm.xlu0 %338, %v344_v36  }
 0x24d   :  { %v103_v37 = vpop.permute.xlu1 %102 }
 0x24e   :  { %v106_v38 = vpop.permute.xlu0 %105  ;;  %v110_v39 = vrot.slane %v103_v37, %v60_v12 }
 0x24f   :  { %v114_v40 = vrot.slane %v106_v38, %v60_v12 }
 0x250   :  { %322 = vmatmul.mubr.msk.f32.vlgmr.msra.gmra.mrb[0].mxu0 %vm123_vm6, %v110_v39 }
 0x251   :  { %327 = vmatmul.mubr.msk.f32.vlgmr.msra.gmra.mrb[0].mxu1 %vm123_vm6, %v114_v40  ;;  %v115_v41 = vsel %vm66_vm2, %v114_v40, %v110_v39 }
 0x252   :  { %v117_v42 = vsel %vm69_vm3, %v115_v41, 0.0  ;;  %v272_v50 = vpop.permute.xlu0 %271 }
 0x253   :  { %118 = vadd.xlane.f32.xlu1 %v117_v42  ;;  %v274_v56 = vmul.f32 %v272_v50, %v268_v49 }
 0x2e0   :  { %v119_v45 = vpop.xlane.xlu1 %118 }
 0x2e1   :  { %v120_v46 = vadd.f32 %v119_v45, %v98_v44 }
 0x2e3   :  { %122 = vst.msk [vmem:[#allocation3] sm:$0x3] %vm30_vm1, %v120_v46 }
 0x2ea   :  { %v287_v47 = vld [vmem:[#allocation3] sm:$0x3] }
 0x2eb   :  { %345 = vrcp.f32 %v287_v47 }
 0x2f5   :  { %v346_v48 = vpop.eup %345 }
 0x2f6   :  { %292 = vperm.xlu0 %338, %v346_v48  }
 0x323   :  { %v192_v51 = vpop.f32.mrb[0].mxu0 }
 0x324   :  { %v264_v52 = vpop.f32.mrb[0].mxu1  ;;  %v323_v53 = vpop.f32.mrb[1].mxu0 }
 0x325   :  { %v277_v54 = vrot.slane %v264_v52, 7  ;;  %v328_v55 = vpop.f32.mrb[1].mxu1 }
 0x327   :  { %v278_v57 = vsel %vm66_vm2, %v277_v54, %v192_v51 }
 0x328   :  { %v280_v58 = vadd.f32 %v278_v57, %v274_v56 }
 0x32a   :  { %282 = vst.msk [vmem:[#allocation4] sm:$0x3] %vm33_vm4, %v280_v58 }
 0x331   :  { %v289_v59 = vld [vmem:[#allocation4] sm:$0x3] }
 0x375   :  { %v293_v60 = vpop.permute.xlu0 %292 }
 0x376   :  { %v295_v61 = vmul.f32 %v293_v60, %v289_v59 }
 0x378   :  { %296 = vst.msk [vmem:[#allocation8] sm:$0x3] %vm33_vm4, %v295_v61 }
 0x379   :  { %380 = shalt.err (!%p377_p12)
}
 0x37a   :  { %s381_s28 = scalar_lea.hbm %s459_s2, 32 }
 0x37b   :  { %p382_p13 = scmp.ne.s32.totalorder %s459_s2, %s381_s28  ;;  %p385_p0 = scmp.lt.u32.totalorder %s381_s28, %s459_s2 }
 0x37d   :  { %p387_p1 = pnand %p385_p0, %p382_p13 }
 0x37f   :  { %390 = shalt.err (!%p387_p1)
}
 0x380   :  { %306 = dma.vmem_to_hbm [thread:$0]  %s304_s1, 32, %s459_s2, [#allocation7]  }
 0x381   :  { %393 = dma.done.wait [#allocation7], 32  }
 0x382   :  { %394 = vsyncadd [#allocation7], 4294967264 }
 0x383   :  { %310 = vsyncpa [#allocation6], 1 }
 0x384   :  { %311 = vsyncpa [#allocation7], 1 }

</bundles_post_ra>
